<compile_context>
chip_gen: v5e
topology: v5e:2x2
jax: 0.10.0
libtpu: 0.0.40
codegen_flags: <defaults>
</compile_context>

<pallas_src>
import functools

import jax
import jax.numpy as jnp
from jax.experimental import pallas as pl
from jax.experimental.pallas import tpu as pltpu


def _round_up(v, m):
    return (v + m - 1) // m * m


def fuse_gate_up(wg, wu, *, ti):
    """Interleave Wg / Wu per ti-slice so a single (H, 2*ti) block at reduction
    step k holds [gate-slice-k | up-slice-k].  One-time weight layout prep
    (do it at load time, not in the hot path)."""
    H, I = wg.shape
    assert wu.shape == (H, I) and I % ti == 0
    nk = I // ti
    return jnp.concatenate(
        [wg.reshape(H, nk, ti), wu.reshape(H, nk, ti)], axis=2
    ).reshape(H, nk * 2 * ti)


def _mlp_kernel(x_ref, wgu_ref, wd_ref, o_ref, acc_ref, *, ti):
    k = pl.program_id(1)                      # reduction (intermediate) axis

    @pl.when(k == 0)
    def _():
        acc_ref[...] = jnp.zeros_like(acc_ref)

    x = x_ref[...]                                              # (tm, H)
    # One fused MXU pass for gate|up: (tm, 2*ti) with f32 accumulation.
    gu = jnp.dot(x, wgu_ref[...], preferred_element_type=jnp.float32)
    g = gu[:, :ti]
    u = gu[:, ti:]
    h = (g * jax.nn.sigmoid(g)) * u                             # SiLU(g)*u, f32
    # This ti-slice's contribution to the down projection, accumulated in f32.
    acc_ref[...] += jnp.dot(h.astype(wd_ref.dtype), wd_ref[...],
                            preferred_element_type=jnp.float32)

    @pl.when(k == pl.num_programs(1) - 1)
    def _():
        o_ref[...] = acc_ref[...].astype(o_ref.dtype)


@functools.partial(jax.jit, static_argnames=("tm", "ti"))
def mlp_forward(x, wgu, wd, *, tm=256, ti=1024):
    """x: [B, S, H]; wgu: [H, 2*I] from fuse_gate_up(..., ti=ti); wd: [I, H].

    Tile guidance at real Qwen3 sizes (H~4096, bf16): tm=256 / ti=512 fits
    v7x's 64 MiB VMEM; tm=512 / ti=1024 is fine on v5e/v6e (128 MiB physical)
    with vmem_limit_bytes raised.
    """
    B, S, H = x.shape
    I = wd.shape[0]
    assert wgu.shape == (H, 2 * I)
    assert I % ti == 0, "intermediate_size must be divisible by ti"

    M = B * S
    # Token tile: multiple of 8 sublanes; collapse to a single tile for tiny M.
    tm = min(tm, _round_up(M, 8))
    tm = _round_up(tm, 8)
    M_pad = _round_up(M, tm)

    x2d = x.reshape(M, H)
    if M_pad != M:
        x2d = jnp.pad(x2d, ((0, M_pad - M), (0, 0)))

    grid = (M_pad // tm, I // ti)
    out2d = pl.pallas_call(
        functools.partial(_mlp_kernel, ti=ti),
        out_shape=jax.ShapeDtypeStruct((M_pad, H), x.dtype),
        grid_spec=pltpu.PrefetchScalarGridSpec(
            num_scalar_prefetch=0,
            grid=grid,
            in_specs=[
                pl.BlockSpec((tm, H), lambda m, k: (m, 0)),      # x token tile
                pl.BlockSpec((H, 2 * ti), lambda m, k: (0, k)),  # gate|up slab
                pl.BlockSpec((ti, H), lambda m, k: (k, 0)),      # down slab
            ],
            out_specs=pl.BlockSpec((tm, H), lambda m, k: (m, 0)),
            scratch_shapes=[pltpu.VMEM((tm, H), jnp.float32)],
        ),
        compiler_params=pltpu.CompilerParams(
            # m shards across TensorCores (v7x megacore); k is the reduction.
            dimension_semantics=("parallel", "arbitrary"),
            vmem_limit_bytes=64 * 1024 * 1024,
        ),
    )(x2d, wgu, wd)

    return out2d[:M].reshape(B, S, H)


def mlp_reference(x, wg, wu, wd):
    """Reference with the same precision choices as the kernel: f32
    accumulation, intermediate h cast to the down-proj weight dtype."""
    xf = x.astype(jnp.float32)
    g = jnp.dot(xf, wg.astype(jnp.float32))
    u = jnp.dot(xf, wu.astype(jnp.float32))
    h = (g * jax.nn.sigmoid(g)) * u
    h = h.astype(wd.dtype).astype(jnp.float32)
    return jnp.dot(h, wd.astype(jnp.float32)).astype(x.dtype)


if __name__ == "__main__":
    # Qwen3Config-implied toy sizes: hidden_size=32, intermediate_size=3072.
    # NOTE: H=32 (<128 lanes) means heavily padded vregs / masked stores at
    # these shapes; benchmark only at realistic hidden sizes.
    B, S, H, I = 2, 8, 32, 3072
    TI = 1024

    key = jax.random.PRNGKey(0)
    kx, kg, ku, kd = jax.random.split(key, 4)

    # bf16 weights/activations (weight-streaming-bound regime), f32 accumulate.
    x = jax.random.normal(kx, (B, S, H), dtype=jnp.float32).astype(jnp.bfloat16)
    wg = (jax.random.normal(kg, (H, I), dtype=jnp.float32) * (1.0 / H) ** 0.5
          ).astype(jnp.bfloat16)
    wu = (jax.random.normal(ku, (H, I), dtype=jnp.float32) * (1.0 / H) ** 0.5
          ).astype(jnp.bfloat16)
    wd = (jax.random.normal(kd, (I, H), dtype=jnp.float32) * (1.0 / I) ** 0.5
          ).astype(jnp.bfloat16)

    wgu = fuse_gate_up(wg, wu, ti=TI)     # one-time weight layout preparation

    out = mlp_forward(x, wgu, wd, ti=TI)
    out = jax.block_until_ready(out)

    ref = mlp_reference(x, wg, wu, wd)
    assert out.shape == (B, S, H)
    err = float(jnp.max(jnp.abs(out.astype(jnp.float32) - ref.astype(jnp.float32))))
    assert err < 3e-2, err

    print("KERNEL_OK")
</pallas_src>

<mosaic_0001>
module attributes {stable_mosaic.version = 11 : i64} {
  func.func @_mlp_kernel(%arg0: i32, %arg1: i32, %arg2: memref<16x32xbf16, #tpu.memory_space<vmem>>, %arg3: memref<32x2048xbf16, #tpu.memory_space<vmem>>, %arg4: memref<1024x32xbf16, #tpu.memory_space<vmem>>, %arg5: memref<16x32xbf16, #tpu.memory_space<vmem>>, %arg6: memref<16x32xf32, #tpu.memory_space<vmem>>) attributes {dimension_semantics = [#tpu.dimension_semantics<parallel>, #tpu.dimension_semantics<arbitrary>], iteration_bounds = array<i64: 1, 3>, scalar_prefetch = 0 : i64, scratch_operands = 1 : i64, tpu.core_type = #tpu.core_type<tc>, window_params = [{transform_indices = @transform_0, window_bounds = array<i64: 16, 32>}, {transform_indices = @transform_1, window_bounds = array<i64: 32, 2048>}, {transform_indices = @transform_2, window_bounds = array<i64: 1024, 32>}, {transform_indices = @transform_3, window_bounds = array<i64: 16, 32>}]} {
    %c0_i32 = arith.constant 0 : i32
    %0 = arith.cmpi eq, %arg1, %c0_i32 : i32
    %1 = arith.extui %0 : i1 to i32
    %c0_i32_0 = arith.constant 0 : i32
    %2 = arith.cmpi ne, %1, %c0_i32_0 : i32
    scf.if %2 {
      %cst_13 = arith.constant 0.000000e+00 : f32
      %24 = vector.broadcast %cst_13 : f32 to vector<16x32xf32>
      %c0_14 = arith.constant 0 : index
      %c0_15 = arith.constant 0 : index
      %25 = vector.load %arg6[%c0_14, %c0_15] : memref<16x32xf32, #tpu.memory_space<vmem>>, vector<16x32xf32>
      tpu.vector_store %arg6[%c0_14, %c0_15], %24 {strides = array<i32>} : memref<16x32xf32, #tpu.memory_space<vmem>>, vector<16x32xf32>,
    } else {
    }
    %c0 = arith.constant 0 : index
    %c0_1 = arith.constant 0 : index
    %3 = vector.load %arg2[%c0, %c0_1] : memref<16x32xbf16, #tpu.memory_space<vmem>>, vector<16x32xbf16>
    %c0_2 = arith.constant 0 : index
    %c0_3 = arith.constant 0 : index
    %4 = vector.load %arg3[%c0_2, %c0_3] : memref<32x2048xbf16, #tpu.memory_space<vmem>>, vector<32x2048xbf16>
    %cst = arith.constant dense<0.000000e+00> : vector<16x2048xf32>
    %5 = tpu.matmul %3, %4, %cst {dimension_numbers = #tpu.dot_dimension_numbers<[1], [0], [0], [1], [0, 0, 1, 1], [], []>} : vector<16x32xbf16>, vector<32x2048xbf16>, vector<16x2048xf32> -> vector<16x2048xf32>
    %6 = vector.extract_strided_slice %5 {offsets = [0, 0], sizes = [16, 1024], strides = [1, 1]} : vector<16x2048xf32> to vector<16x1024xf32>
    %7 = vector.extract_strided_slice %5 {offsets = [0, 1024], sizes = [16, 1024], strides = [1, 1]} : vector<16x2048xf32> to vector<16x1024xf32>
    %8 = arith.negf %6 : vector<16x1024xf32>
    %9 = math.exp %8 : vector<16x1024xf32>
    %cst_4 = arith.constant 1.000000e+00 : f32
    %10 = vector.broadcast %cst_4 : f32 to vector<16x1024xf32>
    %11 = arith.addf %10, %9 : vector<16x1024xf32>
    %12 = arith.divf %10, %11 : vector<16x1024xf32>
    %13 = arith.mulf %6, %12 : vector<16x1024xf32>
    %14 = arith.mulf %13, %7 : vector<16x1024xf32>
    %c0_5 = arith.constant 0 : index
    %c0_6 = arith.constant 0 : index
    %15 = vector.load %arg6[%c0_5, %c0_6] : memref<16x32xf32, #tpu.memory_space<vmem>>, vector<16x32xf32>
    %16 = arith.truncf %14 : vector<16x1024xf32> to vector<16x1024xbf16>
    %c0_7 = arith.constant 0 : index
    %c0_8 = arith.constant 0 : index
    %17 = vector.load %arg4[%c0_7, %c0_8] : memref<1024x32xbf16, #tpu.memory_space<vmem>>, vector<1024x32xbf16>
    %cst_9 = arith.constant dense<0.000000e+00> : vector<16x32xf32>
    %18 = tpu.matmul %16, %17, %cst_9 {dimension_numbers = #tpu.dot_dimension_numbers<[1], [0], [0], [1], [0, 0, 1, 1], [], []>} : vector<16x1024xbf16>, vector<1024x32xbf16>, vector<16x32xf32> -> vector<16x32xf32>
    %19 = arith.addf %15, %18 : vector<16x32xf32>
    %c0_10 = arith.constant 0 : index
    %c0_11 = arith.constant 0 : index
    %20 = vector.load %arg6[%c0_10, %c0_11] : memref<16x32xf32, #tpu.memory_space<vmem>>, vector<16x32xf32>
    tpu.vector_store %arg6[%c0_10, %c0_11], %19 {strides = array<i32>} : memref<16x32xf32, #tpu.memory_space<vmem>>, vector<16x32xf32>,
    %c2_i32 = arith.constant 2 : i32
    %21 = arith.cmpi eq, %arg1, %c2_i32 : i32
    %22 = arith.extui %21 : i1 to i32
    %c0_i32_12 = arith.constant 0 : i32
    %23 = arith.cmpi ne, %22, %c0_i32_12 : i32
    scf.if %23 {
      %c0_13 = arith.constant 0 : index
      %c0_14 = arith.constant 0 : index
      %24 = vector.load %arg6[%c0_13, %c0_14] : memref<16x32xf32, #tpu.memory_space<vmem>>, vector<16x32xf32>
      %25 = arith.truncf %24 : vector<16x32xf32> to vector<16x32xbf16>
      %c0_15 = arith.constant 0 : index
      %c0_16 = arith.constant 0 : index
      %26 = vector.load %arg5[%c0_15, %c0_16] : memref<16x32xbf16, #tpu.memory_space<vmem>>, vector<16x32xbf16>
      tpu.vector_store %arg5[%c0_15, %c0_16], %25 {strides = array<i32>} : memref<16x32xbf16, #tpu.memory_space<vmem>>, vector<16x32xbf16>,
    } else {
    }
    return
  }
  func.func @transform_0(%arg0: i32, %arg1: i32) -> (i32, i32) {
    %c0_i32 = arith.constant 0 : i32
    %c0_i32_0 = arith.constant 0 : i32
    return %arg0, %c0_i32 : i32, i32
  }
  func.func @transform_1(%arg0: i32, %arg1: i32) -> (i32, i32) {
    %c0_i32 = arith.constant 0 : i32
    %c0_i32_0 = arith.constant 0 : i32
    return %c0_i32, %arg1 : i32, i32
  }
  func.func @transform_2(%arg0: i32, %arg1: i32) -> (i32, i32) {
    %c0_i32 = arith.constant 0 : i32
    %c0_i32_0 = arith.constant 0 : i32
    return %arg1, %c0_i32 : i32, i32
  }
  func.func @transform_3(%arg0: i32, %arg1: i32) -> (i32, i32) {
    %c0_i32 = arith.constant 0 : i32
    %c0_i32_0 = arith.constant 0 : i32
    return %arg0, %c0_i32 : i32, i32
  }
}

</mosaic_0001>

<bundles_post_ra>
// kernel: mlp_forward.1
= control target key start
LH: loop header
LB: loop body
LE: loop exit
PB: predicated region body
PF: predicated region fallthrough
CT: control target
= control target key end

     0   :  { %8 = vsyncpa [#allocation5], 0  ;;  %s2564_s12 = smov 0   ;;  %s2566_s13 = smov 0   ;;  %s3456_s0 = inlined_call_operand.vmem [shape: bf16[16,32], index: 0, kind: input, shape index: {}]   ;;  %s3457_s1 = inlined_call_operand.vmem [shape: bf16[32,6144], index: 1, kind: input, shape index: {}]   ;;  %s3458_s2 = inlined_call_operand.vmem [shape: bf16[3072,32], index: 2, kind: input, shape index: {}]   ;;  %s3459_s3 = inlined_call_operand.hbm [shape: bf16[16,32], index: 3, kind: output, shape index: {}]  }
   0x1   :  { %s2568_s14 = smov 0   ;;  %s2570_s15 = smov 0  }
   0x2   :  { %s2572_s16 = smov 0  }
   0x3 LB: > { %s1819_s17 = sadd.s32 4294967295, %s2538_s16   ;;  %s23_s18 = sadd.s32 1, %s2534_s15  ;;  %s2538_s16 = sphi %s2572_s16, %s14_s16   ;;  %s2534_s15 = sphi %s2570_s15, %s3519_s15   ;;  %s2530_s14 = sphi %s2568_s14, %s3518_s14   ;;  %s2526_s13 = sphi %s2566_s13, %s3517_s13   ;;  %s2522_s12 = sphi %s2564_s12, %s3516_s12  }
   0x4   : > { %p24_p0 = scmp.ge.s32.totalorder %s23_s18, 3  ;;  %p66_p1 = scmp.ne.s32.totalorder %s2526_s13, %s2522_s12 }
   0x5   : > { %p67_p2 = scmp.eq.s32.totalorder %s2538_s16, 0  ;;  %s59_s20 = sadd.s32 1, %s2526_s13 }
   0x6   : > { %s3521_s18 = smov (%p24_p0, %s23_s18), 0  ;;  %p1822_p5 = scmp.ge.s32.totalorder %s2538_s16, 3 }
   0x7   : > { %p68_p3 = por %p67_p2, %p66_p1  ;;  %s56_s19 = ssub.s32 %s2534_s15, %s3521_s18 }
   0x8   : > { %p57_p4 = scmp.eq.s32.totalorder %s56_s19, 0  ;;  %153 = sbr.rel (%p1822_p5) target bundleno = 49 (0x31), region = 20 }
   0xa   : > { %s2600_s21 = scalar_select %p57_p4, %s2526_s13, %s59_s20  }
   0xd   : > { %156 = sbr.rel (!%p68_p3) target bundleno = 49 (0x31), region = 24  ;;  %s158_s22 = sand.u32 (%p68_p3), 1, %s2526_s13  }
   0xe   : > { %s2256_s23 = sshll.u32 (%p68_p3), %s2534_s15, 6  ;;  %s1823_s24 = sshll.u32 (%p68_p3), %s158_s22, 8 }
   0xf   : > { %s2608_s27 = scalar_lea.vmem (%p68_p3), %s3457_s1, %s2256_s23  ;;  %s2613_s28 = scalar_lea.vmem (%p68_p3), [#allocation3], %s1823_s24 }
  0x10   : > { %v176_v0 = vld [vmem:[%s2608_s27] sm:$0xff] (%p68_p3)  ;;  %v178_v1 = vld [vmem:[%s2608_s27 + $0x8] sm:$0xff] (%p68_p3)  ;;  %v180_v2 = vld [vmem:[%s2608_s27 + $0x10] sm:$0xff] (%p68_p3) }
  0x11   : > { %177 = vst [vmem:[%s2613_s28] sm:$0xff] (%p68_p3), %v176_v0  ;;  %v182_v3 = vld [vmem:[%s2608_s27 + $0x18] sm:$0xff] (%p68_p3)  ;;  %v184_v4 = vld [vmem:[%s2608_s27 + $0x20] sm:$0xff] (%p68_p3)  ;;  %v186_v5 = vld [vmem:[%s2608_s27 + $0x28] sm:$0xff] (%p68_p3) }
  0x12   : > { %179 = vst [vmem:[%s2613_s28 + $0x8] sm:$0xff] %v178_v1  ;;  %v188_v6 = vld [vmem:[%s2608_s27 + $0x30] sm:$0xff]  ;;  %v190_v7 = vld [vmem:[%s2608_s27 + $0x38] sm:$0xff]  ;;  %v192_v8 = vld [vmem:[%s2608_s27 + $0xc0] sm:$0xff] }
  0x13   : > { %181 = vst [vmem:[%s2613_s28 + $0x10] sm:$0xff] %v180_v2  ;;  %v194_v9 = vld [vmem:[%s2608_s27 + $0xc8] sm:$0xff]  ;;  %v196_v10 = vld [vmem:[%s2608_s27 + $0xd0] sm:$0xff]  ;;  %v198_v11 = vld [vmem:[%s2608_s27 + $0xd8] sm:$0xff] }
  0x14   : > { %183 = vst [vmem:[%s2613_s28 + $0x18] sm:$0xff] %v182_v3  ;;  %v200_v12 = vld [vmem:[%s2608_s27 + $0xe0] sm:$0xff]  ;;  %v202_v13 = vld [vmem:[%s2608_s27 + $0xe8] sm:$0xff]  ;;  %v204_v14 = vld [vmem:[%s2608_s27 + $0xf0] sm:$0xff] }
  0x15   : > { %185 = vst [vmem:[%s2613_s28 + $0x20] sm:$0xff] %v184_v4  ;;  %v206_v15 = vld [vmem:[%s2608_s27 + $0xf8] sm:$0xff]  ;;  %v208_v16 = vld [vmem:[%s2608_s27 + $0x180] sm:$0xff]  ;;  %v210_v17 = vld [vmem:[%s2608_s27 + $0x188] sm:$0xff] }
  0x16   : > { %187 = vst [vmem:[%s2613_s28 + $0x28] sm:$0xff] %v186_v5  ;;  %v212_v18 = vld [vmem:[%s2608_s27 + $0x190] sm:$0xff]  ;;  %v214_v19 = vld [vmem:[%s2608_s27 + $0x198] sm:$0xff]  ;;  %v216_v20 = vld [vmem:[%s2608_s27 + $0x1a0] sm:$0xff] }
  0x17   : > { %189 = vst [vmem:[%s2613_s28 + $0x30] sm:$0xff] %v188_v6  ;;  %v218_v21 = vld [vmem:[%s2608_s27 + $0x1a8] sm:$0xff]  ;;  %v220_v22 = vld [vmem:[%s2608_s27 + $0x1b0] sm:$0xff]  ;;  %v222_v23 = vld [vmem:[%s2608_s27 + $0x1b8] sm:$0xff] }
  0x18   : > { %191 = vst [vmem:[%s2613_s28 + $0x38] sm:$0xff] %v190_v7  ;;  %v224_v24 = vld [vmem:[%s2608_s27 + $0x240] sm:$0xff]  ;;  %v226_v25 = vld [vmem:[%s2608_s27 + $0x248] sm:$0xff]  ;;  %v228_v26 = vld [vmem:[%s2608_s27 + $0x250] sm:$0xff] }
  0x19   : > { %193 = vst [vmem:[%s2613_s28 + $0x40] sm:$0xff] %v192_v8  ;;  %v230_v27 = vld [vmem:[%s2608_s27 + $0x258] sm:$0xff]  ;;  %v232_v28 = vld [vmem:[%s2608_s27 + $0x260] sm:$0xff]  ;;  %v234_v29 = vld [vmem:[%s2608_s27 + $0x268] sm:$0xff] }
  0x1a   : > { %195 = vst [vmem:[%s2613_s28 + $0x48] sm:$0xff] %v194_v9  ;;  %v236_v30 = vld [vmem:[%s2608_s27 + $0x270] sm:$0xff]  ;;  %v238_v31 = vld [vmem:[%s2608_s27 + $0x278] sm:$0xff] }
  0x1b   : > { %197 = vst [vmem:[%s2613_s28 + $0x50] sm:$0xff] %v196_v10 }
  0x1c   : > { %199 = vst [vmem:[%s2613_s28 + $0x58] sm:$0xff] %v198_v11 }
  0x1d   : > { %201 = vst [vmem:[%s2613_s28 + $0x60] sm:$0xff] %v200_v12 }
  0x1e   : > { %203 = vst [vmem:[%s2613_s28 + $0x68] sm:$0xff] %v202_v13 }
  0x1f   : > { %205 = vst [vmem:[%s2613_s28 + $0x70] sm:$0xff] %v204_v14 }
  0x20   : > { %207 = vst [vmem:[%s2613_s28 + $0x78] sm:$0xff] %v206_v15 }
  0x21   : > { %209 = vst [vmem:[%s2613_s28 + $0x80] sm:$0xff] %v208_v16 }
  0x22   : > { %211 = vst [vmem:[%s2613_s28 + $0x88] sm:$0xff] %v210_v17 }
  0x23   : > { %213 = vst [vmem:[%s2613_s28 + $0x90] sm:$0xff] %v212_v18 }
  0x24   : > { %215 = vst [vmem:[%s2613_s28 + $0x98] sm:$0xff] %v214_v19 }
  0x25   : > { %217 = vst [vmem:[%s2613_s28 + $0xa0] sm:$0xff] %v216_v20 }
  0x26   : > { %219 = vst [vmem:[%s2613_s28 + $0xa8] sm:$0xff] %v218_v21 }
  0x27   : > { %221 = vst [vmem:[%s2613_s28 + $0xb0] sm:$0xff] %v220_v22 }
  0x28   : > { %223 = vst [vmem:[%s2613_s28 + $0xb8] sm:$0xff] %v222_v23 }
  0x29   : > { %225 = vst [vmem:[%s2613_s28 + $0xc0] sm:$0xff] %v224_v24 }
  0x2a   : > { %227 = vst [vmem:[%s2613_s28 + $0xc8] sm:$0xff] %v226_v25 }
  0x2b   : > { %229 = vst [vmem:[%s2613_s28 + $0xd0] sm:$0xff] %v228_v26 }
  0x2c   : > { %231 = vst [vmem:[%s2613_s28 + $0xd8] sm:$0xff] %v230_v27 }
  0x2d   : > { %233 = vst [vmem:[%s2613_s28 + $0xe0] sm:$0xff] %v232_v28 }
  0x2e   : > { %235 = vst [vmem:[%s2613_s28 + $0xe8] sm:$0xff] %v234_v29 }
  0x2f   : > { %237 = vst [vmem:[%s2613_s28 + $0xf0] sm:$0xff] %v236_v30 }
  0x30   : > { %239 = vst [vmem:[%s2613_s28 + $0xf8] sm:$0xff] %v238_v31 }
  0x31 PF: > { %p1826_p6 = scmp.ge.s32.totalorder %s2538_s16, 1  ;;  %p253_p7 = scmp.lt.s32.totalorder %s2538_s16, 4 }
  0x33   : > { %p254_p8 = pnand %p1826_p6, %p253_p7 }
  0x34   : > { %s260_s29 = sand.u32 (!%p254_p8), 1, %s2522_s12   ;;  %s1828_s30 = sshll.u32 (!%p254_p8), %s2530_s14, 7 }
  0x35   : > { %257 = sbr.rel (%p254_p8) target bundleno = 456 (0x1c8), region = 51  ;;  %s1827_s4 = sshll.u32 (!%p254_p8), %s260_s29, 8 }
  0x36   : > { %p296_p9 = scmp.lt.s32.totalorder (!%p254_p8), %s1828_s30, 383  ;;  %s2685_s9 = scalar_lea.vmem (!%p254_p8), [#allocation3], %s1827_s4 }
  0x37   : > { %p1830_p10 = scmp.ne.s32.totalorder (!%p254_p8), %s2530_s14, 0 }
  0x3a   : > { %s3523_s30 = smov (!%p296_p9, %s1828_s30), 383  ;;  %306 = sbr.rel (%p1830_p10) target bundleno = 66 (0x42), region = 59 }
  0x3b   : > { %s1829_s5 = sshll.u32 %s3523_s30, 2 }
  0x3c   : > { %s2683_s8 = scalar_lea.vmem %s3458_s2, %s1829_s5 }
  0x3f   : > { %vm307_vm0 = vcmask 261120   ;;  %v2540_v32 = vmov 0.0  }
  0x40   : > { %308 = vst.msk [vmem:[#allocation2] sm:$0xff] %vm307_vm0, %v2540_v32 }
  0x41   : > { %309 = vst.msk [vmem:[#allocation2 + $0x8] sm:$0xff] %vm307_vm0, %v2540_v32 }
  0x42 PF: > { %v1901_v33 = vld [vmem:[%s2685_s9 + $0x80] sm:$0xf]  ;;  %v2274_v35 = vld [vmem:[%s2685_s9 + $0x84] sm:$0xf]  ;;  %v1909_v38 = vld [vmem:[%s2685_s9 + $0x88] sm:$0xf] }
  0x43   : > { %v2282_v34 = vld [vmem:[%s2685_s9 + $0xbc] sm:$0xf0]  ;;  %v1903_v37 = vld [vmem:[%s2685_s9 + $0xc0] sm:$0xf0]  ;;  %v2283_v39 = vld [vmem:[%s2685_s9 + $0xc4] sm:$0xf0] }
  0x44   : > { %v1902_v36 = vor.u32 %v2282_v34, %v1901_v33  ;;  %v1906_v40 = vor.u32 %v2274_v35, %v1903_v37  ;;  %v1910_v41 = vor.u32 %v2283_v39, %v1909_v38  ;;  %v2275_v42 = vld [vmem:[%s2685_s9 + $0x8c] sm:$0xf]  ;;  %v1837_v44 = vld [vmem:[%s2685_s9] sm:$0xf]  ;;  %v2258_v47 = vld [vmem:[%s2685_s9 + $0x4] sm:$0xf] }
  0x45   : > { %v1911_v43 = vld [vmem:[%s2685_s9 + $0xc8] sm:$0xf0]  ;;  %v2266_v46 = vld [vmem:[%s2685_s9 + $0x3c] sm:$0xf0]  ;;  %v1839_v48 = vld [vmem:[%s2685_s9 + $0x40] sm:$0xf0] }
  0x46   : > { %519 = vmatpush.bf16.msra.mxu0 %v1902_v36  ;;  %v1914_v45 = vor.u32 %v2275_v42, %v1911_v43  ;;  %533 = vmatpush.bf16.msra.mxu1 %v1906_v40  ;;  %v1838_v49 = vor.u32 %v2266_v46, %v1837_v44  ;;  %v1842_v50 = vor.u32 %v2258_v47, %v1839_v48  ;;  %v1845_v51 = vld [vmem:[%s2685_s9 + $0x8] sm:$0xf]  ;;  %v2259_v53 = vld [vmem:[%s2685_s9 + $0xc] sm:$0xf]  ;;  %v2707_v56 = vld [vmem:[%s3456_s0] sm:$0xff]  ;;  %vm509_vm1 = vcmask 261120  }
  0x47   : > { %547 = vmatpush.bf16.msra.mxu2 %v1910_v41  ;;  %v2267_v52 = vld [vmem:[%s2685_s9 + $0x44] sm:$0xf0]  ;;  %v1847_v55 = vld [vmem:[%s2685_s9 + $0x48] sm:$0xf0]  ;;  %v1925_v57 = vld [vmem:[%s2685_s9 + $0x98] sm:$0xf] }
  0x48   : > { %561 = vmatpush.bf16.msra.mxu3 %v1914_v45  ;;  %v1846_v54 = vor.u32 %v2267_v52, %v1845_v51  ;;  %v1850_v58 = vor.u32 %v2259_v53, %v1847_v55  ;;  %v2285_v59 = vld [vmem:[%s2685_s9 + $0xd4] sm:$0xf0]  ;;  %v2277_v60 = vld [vmem:[%s2685_s9 + $0x9c] sm:$0xf]  ;;  %v1917_v0 = vld [vmem:[%s2685_s9 + $0x90] sm:$0xf] }
  0x49   : > { %v1927_v61 = vld [vmem:[%s2685_s9 + $0xd8] sm:$0xf0]  ;;  %v1926_v62 = vor.u32 %v2285_v59, %v1925_v57  ;;  %v2284_v1 = vld [vmem:[%s2685_s9 + $0xcc] sm:$0xf0]  ;;  %v1861_v2 = vld [vmem:[%s2685_s9 + $0x18] sm:$0xf] }
  0x4a   : > { %520 = vmatpush.bf16.msra.mxu0 %v1838_v49  ;;  %v1930_v63 = vor.u32 %v2277_v60, %v1927_v61  ;;  %534 = vmatpush.bf16.msra.mxu1 %v1842_v50  ;;  %v1918_v3 = vor.u32 %v2284_v1, %v1917_v0  ;;  %v2269_v4 = vld [vmem:[%s2685_s9 + $0x54] sm:$0xf0]  ;;  %v2276_v5 = vld [vmem:[%s2685_s9 + $0x94] sm:$0xf]  ;;  %v2261_v9 = vld [vmem:[%s2685_s9 + $0x1c] sm:$0xf] }
  0x4b   : > { %548 = vmatpush.bf16.msra.mxu2 %v1846_v54  ;;  %v1919_v6 = vld [vmem:[%s2685_s9 + $0xd0] sm:$0xf0]  ;;  %v1862_v7 = vor.u32 %v2269_v4, %v1861_v2  ;;  %v1863_v10 = vld [vmem:[%s2685_s9 + $0x58] sm:$0xf0]  ;;  %v1853_v11 = vld [vmem:[%s2685_s9 + $0x10] sm:$0xf] }
  0x4c   : > { %562 = vmatpush.bf16.msra.mxu3 %v1850_v58  ;;  %v1922_v8 = vor.u32 %v2276_v5, %v1919_v6  ;;  %v1866_v12 = vor.u32 %v2261_v9, %v1863_v10  ;;  %v2268_v13 = vld [vmem:[%s2685_s9 + $0x4c] sm:$0xf0]  ;;  %v2260_v14 = vld [vmem:[%s2685_s9 + $0x14] sm:$0xf]  ;;  %v1941_v16 = vld [vmem:[%s2685_s9 + $0xa8] sm:$0xf] }
  0x4d   : > { %1963 = vmatmul.msk.bf16.vlgmr.msra.gmra.mxu0 %vm509_vm1, %v2707_v56  ;;  %v1855_v15 = vld [vmem:[%s2685_s9 + $0x50] sm:$0xf0]  ;;  %1964 = vmatmul.msk.bf16.vlgmr.msra.gmra.mxu1 %vm509_vm1, %v2707_v56  ;;  %v2287_v17 = vld [vmem:[%s2685_s9 + $0xe4] sm:$0xf0]  ;;  %v2279_v18 = vld [vmem:[%s2685_s9 + $0xac] sm:$0xf]  ;;  %v1854_v19 = vor.u32 %v2268_v13, %v1853_v11 }
  0x4e   : > { %1965 = vmatmul.msk.bf16.vlgmr.msra.gmra.mxu2 %vm509_vm1, %v2707_v56  ;;  %575 = vmatpush.bf16.msrb.mxu0 %v1918_v3  ;;  %v1942_v20 = vor.u32 %v2287_v17, %v1941_v16  ;;  %v1943_v21 = vld [vmem:[%s2685_s9 + $0xe8] sm:$0xf0]  ;;  %v1933_v22 = vld [vmem:[%s2685_s9 + $0xa0] sm:$0xf]  ;;  %v1858_v24 = vor.u32 %v2260_v14, %v1855_v15  ;;  %v1877_v27 = vld [vmem:[%s2685_s9 + $0x28] sm:$0xf] }
  0x4f   : > { %603 = vmatpush.bf16.msrb.mxu2 %v1926_v62  ;;  %1966 = vmatmul.msk.bf16.vlgmr.msra.gmra.mxu3 %vm509_vm1, %v2707_v56  ;;  %v2286_v23 = vld [vmem:[%s2685_s9 + $0xdc] sm:$0xf0]  ;;  %v1946_v25 = vor.u32 %v2279_v18, %v1943_v21  ;;  %v2271_v28 = vld [vmem:[%s2685_s9 + $0x64] sm:$0xf0]  ;;  %v2278_v29 = vld [vmem:[%s2685_s9 + $0xa4] sm:$0xf] }
  0x50   : > { %617 = vmatpush.bf16.msrb.mxu3 %v1930_v63  ;;  %589 = vmatpush.bf16.msrb.mxu1 %v1922_v8  ;;  %v1934_v26 = vor.u32 %v2286_v23, %v1933_v22  ;;  %v1878_v30 = vor.u32 %v2271_v28, %v1877_v27  ;;  %v1935_v31 = vld [vmem:[%s2685_s9 + $0xe0] sm:$0xf0]  ;;  %v2263_v32 = vld [vmem:[%s2685_s9 + $0x2c] sm:$0xf]  ;;  %v1869_v36 = vld [vmem:[%s2685_s9 + $0x20] sm:$0xf] }
  0x51   : > { %v1879_v33 = vld [vmem:[%s2685_s9 + $0x68] sm:$0xf0]  ;;  %v1938_v34 = vor.u32 %v2278_v29, %v1935_v31  ;;  %v2270_v37 = vld [vmem:[%s2685_s9 + $0x5c] sm:$0xf0]  ;;  %v2262_v38 = vld [vmem:[%s2685_s9 + $0x24] sm:$0xf] }
  0x52   : > { %v1882_v35 = vor.u32 %v2263_v32, %v1879_v33  ;;  %576 = vmatpush.bf16.msrb.mxu0 %v1854_v19  ;;  %v1871_v39 = vld [vmem:[%s2685_s9 + $0x60] sm:$0xf0]  ;;  %v1870_v40 = vor.u32 %v2270_v37, %v1869_v36  ;;  %v1957_v42 = vld [vmem:[%s2685_s9 + $0xb8] sm:$0xf]  ;;  %v2281_v44 = vld [vmem:[%s2685_s9 + $0xbc] sm:$0xf] }
  0x53   : > { %604 = vmatpush.bf16.msrb.mxu2 %v1862_v7  ;;  %v1874_v41 = vor.u32 %v2262_v38, %v1871_v39  ;;  %v2289_v43 = vld [vmem:[%s2685_s9 + $0xf4] sm:$0xf0]  ;;  %v1959_v45 = vld [vmem:[%s2685_s9 + $0xf8] sm:$0xf0]  ;;  %v1949_v46 = vld [vmem:[%s2685_s9 + $0xb0] sm:$0xf] }
  0x54   : > { %618 = vmatpush.bf16.msrb.mxu3 %v1866_v12  ;;  %590 = vmatpush.bf16.msrb.mxu1 %v1858_v24  ;;  %v2288_v47 = vld [vmem:[%s2685_s9 + $0xec] sm:$0xf0]  ;;  %v2280_v48 = vld [vmem:[%s2685_s9 + $0xb4] sm:$0xf]  ;;  %v1958_v50 = vor.u32 %v2289_v43, %v1957_v42  ;;  %v1962_v51 = vor.u32 %v2281_v44, %v1959_v45  ;;  %v1893_v53 = vld [vmem:[%s2685_s9 + $0x38] sm:$0xf] }
  0x55   : > { %v1951_v49 = vld [vmem:[%s2685_s9 + $0xf0] sm:$0xf0]  ;;  %v1950_v52 = vor.u32 %v2288_v47, %v1949_v46  ;;  %v2273_v54 = vld [vmem:[%s2685_s9 + $0x74] sm:$0xf0]  ;;  %v2265_v55 = vld [vmem:[%s2685_s9 + $0x3c] sm:$0xf] }
  0x56   : > { %631 = vmatpush.bf16.msra.mxu0 %v1934_v26  ;;  %v1954_v57 = vor.u32 %v2280_v48, %v1951_v49  ;;  %v1895_v58 = vld [vmem:[%s2685_s9 + $0x78] sm:$0xf0]  ;;  %v1885_v59 = vld [vmem:[%s2685_s9 + $0x30] sm:$0xf]  ;;  %v2264_v61 = vld [vmem:[%s2685_s9 + $0x34] sm:$0xf]  ;;  %v1894_v63 = vor.u32 %v2273_v54, %v1893_v53 }
  0x57   : > { %659 = vmatpush.bf16.msra.mxu2 %v1942_v20  ;;  %v2272_v60 = vld [vmem:[%s2685_s9 + $0x6c] sm:$0xf0]  ;;  %v1887_v62 = vld [vmem:[%s2685_s9 + $0x70] sm:$0xf0]  ;;  %v1898_v0 = vor.u32 %v2265_v55, %v1895_v58  ;;  %v2297_v3 = vld [vmem:[%s2683_s8 + $0x38] sm:$0xff]  ;;  %p2251_p11 = scmp.ne.s32.totalorder %s2530_s14, 2 }
  0x58   : > { %673 = vmatpush.bf16.msra.mxu3 %v1946_v25  ;;  %645 = vmatpush.bf16.msra.mxu1 %v1938_v34  ;;  %v1886_v1 = vor.u32 %v2272_v60, %v1885_v59  ;;  %v1890_v2 = vor.u32 %v2264_v61, %v1887_v62  ;;  %v2305_v4 = vld [vmem:[%s2683_s8 + $0x78] sm:$0xff]  ;;  %v2296_v5 = vld [vmem:[%s2683_s8 + $0x30] sm:$0xff]  ;;  %v2295_v9 = vld [vmem:[%s2683_s8 + $0x28] sm:$0xff] }
  0x59   : > { %v2304_v6 = vld [vmem:[%s2683_s8 + $0x70] sm:$0xff]  ;;  %v2313_v7 = vld [vmem:[%s2683_s8 + $0xb8] sm:$0xff]  ;;  %v2294_v12 = vld [vmem:[%s2683_s8 + $0x20] sm:$0xff] }
  0x5a   : > { %632 = vmatpush.bf16.msra.mxu0 %v1870_v40  ;;  %v2321_v8 = vld [vmem:[%s2683_s8 + $0xf8] sm:$0xff]  ;;  %v2312_v10 = vld [vmem:[%s2683_s8 + $0xb0] sm:$0xff]  ;;  %v2302_v13 = vld [vmem:[%s2683_s8 + $0x60] sm:$0xff] }
  0x5b   : > { %660 = vmatpush.bf16.msra.mxu2 %v1878_v30  ;;  %v2320_v11 = vld [vmem:[%s2683_s8 + $0xf0] sm:$0xff]  ;;  %v2311_v14 = vld [vmem:[%s2683_s8 + $0xa8] sm:$0xff]  ;;  %v2293_v20 = vld [vmem:[%s2683_s8 + $0x18] sm:$0xff] }
  0x5c   : > { %674 = vmatpush.bf16.msra.mxu3 %v1882_v35  ;;  %646 = vmatpush.bf16.msra.mxu1 %v1874_v41  ;;  %v2319_v15 = vld [vmem:[%s2683_s8 + $0xe8] sm:$0xff]  ;;  %v2301_v21 = vld [vmem:[%s2683_s8 + $0x58] sm:$0xff]  ;;  %v2310_v22 = vld [vmem:[%s2683_s8 + $0xa0] sm:$0xff] }
  0x5d   : > { %1967 = vmatmul.msk.bf16.vlgmr.msrb.gmra.mxu0 %vm509_vm1, %v2707_v56  ;;  %1968 = vmatmul.msk.bf16.vlgmr.msrb.gmra.mxu1 %vm509_vm1, %v2707_v56  ;;  %v2318_v23 = vld [vmem:[%s2683_s8 + $0xe0] sm:$0xff]  ;;  %v2292_v28 = vld [vmem:[%s2683_s8 + $0x10] sm:$0xff]  ;;  %v2309_v38 = vld [vmem:[%s2683_s8 + $0x98] sm:$0xff] }
  0x5e   : > { %1969 = vmatmul.msk.bf16.vlgmr.msrb.gmra.mxu2 %vm509_vm1, %v2707_v56  ;;  %687 = vmatpush.bf16.msrb.mxu0 %v1950_v52  ;;  %v2300_v29 = vld [vmem:[%s2683_s8 + $0x50] sm:$0xff]  ;;  %v2317_v39 = vld [vmem:[%s2683_s8 + $0xd8] sm:$0xff]  ;;  %v2291_v45 = vld [vmem:[%s2683_s8 + $0x8] sm:$0xff] }
  0x5f   : > { %1970 = vmatmul.msk.bf16.vlgmr.msrb.gmra.mxu3 %vm509_vm1, %v2707_v56  ;;  %715 = vmatpush.bf16.msrb.mxu2 %v1958_v50  ;;  %v2299_v49 = vld [vmem:[%s2683_s8 + $0x48] sm:$0xff]  ;;  %v2308_v52 = vld [vmem:[%s2683_s8 + $0x90] sm:$0xff]  ;;  %v2290_v59 = vld [vmem:[%s2683_s8] sm:$0xff] }
  0x60   : > { %729 = vmatpush.bf16.msrb.mxu3 %v1962_v51  ;;  %701 = vmatpush.bf16.msrb.mxu1 %v1954_v57  ;;  %v2316_v53 = vld [vmem:[%s2683_s8 + $0xd0] sm:$0xff]  ;;  %v2298_v60 = vld [vmem:[%s2683_s8 + $0x40] sm:$0xff] }
  0x62   : > { %688 = vmatpush.bf16.msrb.mxu0 %v1886_v1 }
  0x63   : > { %716 = vmatpush.bf16.msrb.mxu2 %v1894_v63 }
  0x64   : > { %730 = vmatpush.bf16.msrb.mxu3 %v1898_v0  ;;  %702 = vmatpush.bf16.msrb.mxu1 %v1890_v2 }
  0x6d   : > { %1971 = vmatmul.msk.bf16.vlgmr.msra.gmra.mxu0 %vm509_vm1, %v2707_v56  ;;  %1972 = vmatmul.msk.bf16.vlgmr.msra.gmra.mxu1 %vm509_vm1, %v2707_v56 }
  0x6e   : > { %1973 = vmatmul.msk.bf16.vlgmr.msra.gmra.mxu2 %vm509_vm1, %v2707_v56  ;;  %1595 = vmatpush.bf16.msra.mxu0 %v2297_v3 }
  0x6f   : > { %1974 = vmatmul.msk.bf16.vlgmr.msra.gmra.mxu3 %vm509_vm1, %v2707_v56  ;;  %1609 = vmatpush.bf16.msra.mxu1 %v2305_v4 }
  0x70   : > { %1623 = vmatpush.bf16.msra.mxu2 %v2313_v7  ;;  %1637 = vmatpush.bf16.msra.mxu3 %v2321_v8 }
  0x72   : > { %1596 = vmatpush.bf16.msra.mxu0 %v2296_v5 }
  0x73   : > { %1610 = vmatpush.bf16.msra.mxu1 %v2304_v6 }
  0x74   : > { %1624 = vmatpush.bf16.msra.mxu2 %v2312_v10  ;;  %1638 = vmatpush.bf16.msra.mxu3 %v2320_v11  ;;  %v2329_v11 = vld [vmem:[%s2683_s8 + $0x138] sm:$0xff] }
  0x76   : > { %1597 = vmatpush.bf16.msra.mxu0 %v2295_v9 }
  0x78   : > { %1625 = vmatpush.bf16.msra.mxu2 %v2311_v14  ;;  %1639 = vmatpush.bf16.msra.mxu3 %v2319_v15 }
  0x7a   : > { %1598 = vmatpush.bf16.msra.mxu0 %v2294_v12  ;;  %v2337_v12 = vld [vmem:[%s2683_s8 + $0x178] sm:$0xff] }
  0x7c   : > { %1626 = vmatpush.bf16.msra.mxu2 %v2310_v22  ;;  %1640 = vmatpush.bf16.msra.mxu3 %v2318_v23 }
  0x7d   : > { %1975 = vmatmul.msk.bf16.vlgmr.msrb.gmra.mxu0 %vm509_vm1, %v2707_v56  ;;  %1976 = vmatmul.msk.bf16.vlgmr.msrb.gmra.mxu1 %vm509_vm1, %v2707_v56 }
  0x7e   : > { %1977 = vmatmul.msk.bf16.vlgmr.msrb.gmra.mxu2 %vm509_vm1, %v2707_v56  ;;  %1599 = vmatpush.bf16.msra.mxu0 %v2293_v20  ;;  %v2352_v20 = vld [vmem:[%s2683_s8 + $0x1f0] sm:$0xff] }
  0x7f   : > { %1978 = vmatmul.msk.bf16.vlgmr.msrb.gmra.mxu3 %vm509_vm1, %v2707_v56  ;;  %v2303_v56 = vld [vmem:[%s2683_s8 + $0x68] sm:$0xff] }
  0x80   : > { %1611 = vmatpush.bf16.msra.mxu1 %v2303_v56  ;;  %1627 = vmatpush.bf16.msra.mxu2 %v2309_v38  ;;  %v2336_v38 = vld [vmem:[%s2683_s8 + $0x170] sm:$0xff] }
  0x81   : > { %1641 = vmatpush.bf16.msra.mxu3 %v2317_v39 }
  0x82   : > { %1600 = vmatpush.bf16.msra.mxu0 %v2292_v28 }
  0x84   : > { %1612 = vmatpush.bf16.msra.mxu1 %v2302_v13  ;;  %1628 = vmatpush.bf16.msra.mxu2 %v2308_v52 }
  0x85   : > { %1642 = vmatpush.bf16.msra.mxu3 %v2316_v53 }
  0x86   : > { %1601 = vmatpush.bf16.msra.mxu0 %v2291_v45  ;;  %v2306_v45 = vld [vmem:[%s2683_s8 + $0x80] sm:$0xff] }
  0x88   : > { %1613 = vmatpush.bf16.msra.mxu1 %v2301_v21 }
  0x8a   : > { %1602 = vmatpush.bf16.msra.mxu0 %v2290_v59 }
  0x8c   : > { %1614 = vmatpush.bf16.msra.mxu1 %v2300_v29 }
  0x8e   : > { %1651 = vmatpush.bf16.msrb.mxu0 %v2329_v11 }
  0x90   : > { %1615 = vmatpush.bf16.msra.mxu1 %v2299_v49 }
  0x94   : > { %1616 = vmatpush.bf16.msra.mxu1 %v2298_v60 }
  0x98   : > { %1665 = vmatpush.bf16.msrb.mxu1 %v2337_v12 }
  0x9c   : > { %1666 = vmatpush.bf16.msrb.mxu1 %v2336_v38  ;;  %v2326_v38 = vld [vmem:[%s2683_s8 + $0x120] sm:$0xff] }
  0xca   : > { %v2803_v16 = vpop.f32.mrf.mxu0  ;;  %v2806_v18 = vpop.f32.mrf.mxu1 }
  0xcb   : > { %v1979_v17 = vmul.f32 -1.442695, %v2803_v16  ;;  %v1980_v19 = vmul.f32 -1.442695, %v2806_v18 }
  0xcd   : > { %2404 = vpow2.f32 %v1979_v17  ;;  %v2307_v17 = vld [vmem:[%s2683_s8 + $0x88] sm:$0xff] }
  0xce   : > { %2406 = vpow2.f32 %v1980_v19  ;;  %v2315_v19 = vld [vmem:[%s2683_s8 + $0xc8] sm:$0xff]  ;;  %1629 = vmatpush.bf16.msra.mxu2 %v2307_v17 }
  0xcf   : > { %1643 = vmatpush.bf16.msra.mxu3 %v2315_v19  ;;  %v2344_v19 = vld [vmem:[%s2683_s8 + $0x1b0] sm:$0xff] }
  0xd1   : > { %v2813_v24 = vpop.f32.mrf.mxu2 }
  0xd2   : > { %v1981_v25 = vmul.f32 -1.442695, %v2813_v24  ;;  %v2816_v26 = vpop.f32.mrf.mxu3  ;;  %v2818_v27 = vpop.f32.mrf.mxu0  ;;  %1630 = vmatpush.bf16.msra.mxu2 %v2306_v45 }
  0xd3   : > { %v2405_v30 = vpop.eup %2404  ;;  %v1982_v31 = vmul.f32 -1.442695, %v2816_v26  ;;  %v2823_v32 = vpop.f32.mrf.mxu1  ;;  %v1987_v35 = vmul.f32 -1.442695, %v2818_v27 }
  0xd4   : > { %v2407_v33 = vpop.eup %2406  ;;  %v2825_v34 = vadd.f32 1.0, %v2405_v30  ;;  %2408 = vpow2.f32 %v1981_v25  ;;  %v1988_v37 = vmul.f32 -1.442695, %v2823_v32 }
  0xd5   : > { %v2828_v36 = vadd.f32 1.0, %v2407_v33  ;;  %2410 = vpow2.f32 %v1982_v31 }
  0xd6   : > { %2412 = vrcp.f32 %v2825_v34  ;;  %v810_v3 = vand.u32 2147483647, %v2825_v34  ;;  %v812_v4 = vand.u32 2147483648, %v2825_v34  ;;  %vm806_vm2 = vweird.f32 %v2825_v34 }
  0xd7   : > { %2414 = vrcp.f32 %v2828_v36  ;;  %v825_v5 = vand.u32 2147483647, %v2828_v36  ;;  %vm821_vm3 = vweird.f32 %v2828_v36  ;;  %v827_v14 = vand.u32 2147483648, %v2828_v36 }
  0xd8   : > { %2416 = vpow2.f32 %v1987_v35  ;;  %vm2892_vm4 = vcmp.eq.f32.partialorder %v810_v3, 8.507059e+37  ;;  %v813_v21 = vor.u32 1.1754944e-38, %v812_v4  ;;  %v2327_v3 = vld [vmem:[%s2683_s8 + $0x128] sm:$0xff] }
  0xd9   : > { %2418 = vpow2.f32 %v1988_v37  ;;  %v2835_v40 = vpop.f32.mrf.mxu2  ;;  %vm2896_vm5 = vcmp.eq.f32.partialorder %v825_v5, 8.507059e+37  ;;  %v2328_v37 = vld [vmem:[%s2683_s8 + $0x130] sm:$0xff]  ;;  %v828_v52 = vor.u32 1.1754944e-38, %v827_v14  ;;  %v2335_v4 = vld [vmem:[%s2683_s8 + $0x168] sm:$0xff] }
  0xda   : > { %v2409_v41 = vpop.eup %2408  ;;  %v2839_v44 = vpop.f32.mrf.mxu3  ;;  %v1989_v48 = vmul.f32 -1.442695, %v2835_v40  ;;  %1652 = vmatpush.bf16.msrb.mxu0 %v2328_v37  ;;  %1667 = vmatpush.bf16.msrb.mxu1 %v2335_v4  ;;  %v2348_v4 = vld [vmem:[%s2683_s8 + $0x1d0] sm:$0xff] }
  0xdb   : > { %v2411_v42 = vpop.eup %2410  ;;  %v2837_v43 = vadd.f32 1.0, %v2409_v41  ;;  %v1990_v57 = vmul.f32 -1.442695, %v2839_v44  ;;  %v2865_v1 = vpop.f32.mrf.mxu0 }
  0xdc   : > { %v2842_v46 = vpop.eup %2412  ;;  %v2844_v47 = vadd.f32 1.0, %v2411_v42  ;;  %v2876_v8 = vpop.f32.mrf.mxu1  ;;  %v1983_v10 = vmul.f32 -1.442695, %v2865_v1 }
  0xdd   : > { %v2848_v50 = vpop.eup %2414  ;;  %v802_v51 = vmul.f32 %v2842_v46, %v2825_v34  ;;  %2420 = vrcp.f32 %v2837_v43  ;;  %v2901_v23 = vmul.f32 -1.442695, %v2876_v8  ;;  %vm807_vm6 = vweird.f32 %v2842_v46 }
  0xde   : > { %v2417_v54 = vpop.eup %2416  ;;  %v817_v55 = vmul.f32 %v2848_v50, %v2828_v36  ;;  %2422 = vrcp.f32 %v2844_v47  ;;  %vm822_vm7 = vweird.f32 %v2848_v50  ;;  %v840_v39 = vand.u32 2147483647, %v2837_v43  ;;  %vm2924_vm8 = vmor %vm806_vm2, %vm807_vm6  ;;  %1653 = vmatpush.bf16.msrb.mxu0 %v2327_v3 }
  0xdf   : > { %v2419_v58 = vpop.eup %2418  ;;  %v803_v61 = vsub.f32 1.0, %v802_v51  ;;  %2424 = vpow2.f32 %v1989_v48  ;;  %v2861_v63 = vadd.f32 1.0, %v2417_v54  ;;  %v842_v41 = vand.u32 2147483648, %v2837_v43  ;;  %v2314_v48 = vld [vmem:[%s2683_s8 + $0xc0] sm:$0xff]  ;;  %vm2943_vm9 = vmor %vm821_vm3, %vm822_vm7 }
  0xe0   : > { %v818_v62 = vsub.f32 1.0, %v817_v55  ;;  %v2863_v0 = vadd.f32 1.0, %v2419_v58  ;;  %2426 = vpow2.f32 %v1990_v57  ;;  %v857_v42 = vand.u32 2147483648, %v2844_v47  ;;  %v2345_v57 = vld [vmem:[%s2683_s8 + $0x1b8] sm:$0xff]  ;;  %1644 = vmatpush.bf16.msra.mxu3 %v2314_v48 }
  0xe1   : > { %2428 = vrcp.f32 %v2861_v63  ;;  %v804_v6 = vmul.f32 %v2842_v46, %v803_v61  ;;  %v855_v53 = vand.u32 2147483647, %v2844_v47  ;;  %v2932_v55 = vpop.f32.mrf.mxu2  ;;  %v2353_v58 = vld [vmem:[%s2683_s8 + $0x1f8] sm:$0xff]  ;;  %vm836_vm10 = vweird.f32 %v2837_v43  ;;  %1679 = vmatpush.bf16.msrb.mxu2 %v2345_v57 }
  0xe2   : > { %v819_v56 = vmul.f32 %v2848_v50, %v818_v62  ;;  %2430 = vrcp.f32 %v2863_v0  ;;  %vm851_vm11 = vweird.f32 %v2844_v47  ;;  %vm2960_vm12 = vcmp.eq.f32.partialorder %v840_v39, 8.507059e+37  ;;  %v2334_v39 = vld [vmem:[%s2683_s8 + $0x160] sm:$0xff]  ;;  %1654 = vmatpush.bf16.msrb.mxu0 %v2326_v38  ;;  %v2332_v38 = vld [vmem:[%s2683_s8 + $0x150] sm:$0xff] }
  0xe3   : > { %v2867_v2 = vpop.eup %2420  ;;  %v805_v28 = vadd.f32 %v2842_v46, %v804_v6  ;;  %2432 = vpow2.f32 %v1983_v10  ;;  %v2964_v6 = vor.u32 1.1754944e-38, %v842_v41  ;;  %vm2972_vm14 = vcmp.eq.f32.partialorder %v855_v53, 8.507059e+37  ;;  %v2992_v22 = vpop.f32.mrf.mxu0  ;;  %1668 = vmatpush.bf16.msrb.mxu1 %v2334_v39 }
  0xe4   : > { %v832_v7 = vmul.f32 %v2867_v2, %v2837_v43  ;;  %v2878_v9 = vpop.eup %2422  ;;  %v820_v31 = vadd.f32 %v2848_v50, %v819_v56  ;;  %1693 = vmatpush.bf16.msrb.mxu3 %v2353_v58  ;;  %vm837_vm13 = vweird.f32 %v2867_v2  ;;  %v932_v12 = vand.u32 2147483648, %v2861_v63 }
  0xe5   : > { %v2425_v13 = vpop.eup %2424  ;;  %v847_v15 = vmul.f32 %v2878_v9, %v2844_v47  ;;  %v809_v34 = vsel %vm2924_vm8, %v2842_v46, %v805_v28  ;;  %vm852_vm15 = vweird.f32 %v2878_v9  ;;  %vm926_vm0 = vweird.f32 %v2861_v63  ;;  %1680 = vmatpush.bf16.msrb.mxu2 %v2344_v19  ;;  %vm3008_vm2 = vmor %vm836_vm10, %vm837_vm13 }
  0xe6   : > { %v2427_v25 = vpop.eup %2426  ;;  %v833_v29 = vsub.f32 1.0, %v832_v7  ;;  %v2909_v35 = vadd.f32 1.0, %v2425_v13  ;;  %v824_v46 = vsel %vm2943_vm9, %v2848_v50, %v820_v31  ;;  %v2966_v7 = vor.u32 1.1754944e-38, %v857_v42  ;;  %v2978_v13 = vpop.f32.mrf.mxu3 }
  0xe7   : > { %v2906_v30 = vpop.eup %2428  ;;  %v848_v33 = vsub.f32 1.0, %v847_v15  ;;  %v2930_v54 = vadd.f32 1.0, %v2427_v25  ;;  %v1985_v50 = vmul.f32 -1.442695, %v2932_v55  ;;  %v814_v10 = vsel %vm2892_vm4, %v813_v21, %v809_v34  ;;  %vm3025_vm4 = vmor %vm851_vm11, %vm852_vm15 }
  0xe8   : > { %v2918_v49 = vpop.eup %2430  ;;  %2434 = vrcp.f32 %v2909_v35  ;;  %v834_v60 = vmul.f32 %v2867_v2, %v833_v29  ;;  %v922_v61 = vmul.f32 %v2906_v30, %v2861_v63  ;;  %v829_v14 = vsel %vm2896_vm5, %v828_v52, %v824_v46  ;;  %1694 = vmatpush.bf16.msrb.mxu3 %v2352_v20  ;;  %v3032_v52 = vpop.f32.mrf.mxu1 }
  0xe9   : > { %v849_v62 = vmul.f32 %v2878_v9, %v848_v33  ;;  %v937_v36 = vmul.f32 %v2918_v49, %v2863_v0  ;;  %v2433_v56 = vpop.eup %2432  ;;  %2436 = vrcp.f32 %v2930_v54  ;;  %v930_v31 = vand.u32 2147483647, %v2861_v63  ;;  %v3052_v46 = vpop.f32.mrf.mxu2 }
  0xea   : > { %v835_v15 = vadd.f32 %v2867_v2, %v834_v60  ;;  %v923_v17 = vsub.f32 1.0, %v922_v61  ;;  %v2989_v29 = vadd.f32 1.0, %v2433_v56  ;;  %2438 = vpow2.f32 %v2901_v23 }
  0xeb   : > { %v850_v25 = vadd.f32 %v2878_v9, %v849_v62  ;;  %v938_v28 = vsub.f32 1.0, %v937_v36  ;;  %v947_v33 = vand.u32 2147483648, %v2863_v0  ;;  %v3002_v41 = vmul.f32 %v814_v10, %v2803_v16  ;;  %v2333_v62 = vld [vmem:[%s2683_s8 + $0x158] sm:$0xff] }
  0xec   : > { %vm941_vm3 = vweird.f32 %v2863_v0  ;;  %v945_v42 = vand.u32 2147483647, %v2863_v0  ;;  %2440 = vrcp.f32 %v2989_v29  ;;  %v3016_v45 = vmul.f32 %v829_v14, %v2806_v18  ;;  %v2343_v18 = vld [vmem:[%s2683_s8 + $0x1a8] sm:$0xff]  ;;  %1669 = vmatpush.bf16.msrb.mxu1 %v2333_v62  ;;  %v2342_v14 = vld [vmem:[%s2683_s8 + $0x1a0] sm:$0xff] }
  0xed   : > { %v839_v16 = vsel %vm3008_vm2, %v2867_v2, %v835_v15  ;;  %v924_v48 = vmul.f32 %v2906_v30, %v923_v17  ;;  %v3030_v51 = vor.u32 1.1754944e-38, %v932_v12  ;;  %v2351_v2 = vld [vmem:[%s2683_s8 + $0x1e8] sm:$0xff]  ;;  %v854_v47 = vsel %vm3025_vm4, %v2878_v9, %v850_v25  ;;  %1681 = vmatpush.bf16.msrb.mxu2 %v2343_v18  ;;  %v2325_v9 = vld [vmem:[%s2683_s8 + $0x118] sm:$0xff]  ;;  %v2350_v15 = vld [vmem:[%s2683_s8 + $0x1e0] sm:$0xff] }
  0xee   : > { %v2986_v21 = vpop.eup %2434  ;;  %v939_v57 = vmul.f32 %v2918_v49, %v938_v28  ;;  %2442 = vpow2.f32 %v1985_v50  ;;  %vm927_vm5 = vweird.f32 %v2906_v30  ;;  %vm3043_vm6 = vcmp.eq.f32.partialorder %v930_v31, 8.507059e+37  ;;  %1695 = vmatpush.bf16.msrb.mxu3 %v2351_v2  ;;  %1655 = vmatpush.bf16.msrb.mxu0 %v2325_v9  ;;  %v3080_v11 = vpop.f32.mrf.mxu3  ;;  %v2349_v2 = vld [vmem:[%s2683_s8 + $0x1d8] sm:$0xff]  ;;  %v2323_v62 = vld [vmem:[%s2683_s8 + $0x108] sm:$0xff] }
  0xef   : > { %v952_v37 = vmul.f32 %v2986_v21, %v2909_v35  ;;  %v3036_v53 = vpop.eup %2436  ;;  %v3047_v59 = vor.u32 1.1754944e-38, %v947_v33  ;;  %v962_v60 = vand.u32 2147483648, %v2909_v35  ;;  %v844_v3 = vsel %vm2960_vm12, %v2964_v6, %v839_v16  ;;  %vm3099_vm10 = vmor %vm926_vm0, %vm927_vm5  ;;  %v3106_v16 = vpop.f32.mrf.mxu0 }
  0xf0   : > { %v967_v61 = vmul.f32 %v3036_v53, %v2930_v54  ;;  %v2439_v36 = vpop.eup %2438  ;;  %vm942_vm7 = vweird.f32 %v2918_v49  ;;  %vm3060_vm8 = vcmp.eq.f32.partialorder %v945_v42, 8.507059e+37  ;;  %vm956_vm9 = vweird.f32 %v2909_v35  ;;  %1670 = vmatpush.bf16.msrb.mxu1 %v2332_v38  ;;  %v3136_v9 = vpop.f32.mrf.mxu1 }
  0xf1   : > { %v953_v58 = vsub.f32 1.0, %v952_v37  ;;  %v960_v50 = vand.u32 2147483647, %v2909_v35  ;;  %v1986_v56 = vmul.f32 -1.442695, %v2978_v13  ;;  %v859_v10 = vsel %vm2972_vm14, %v2966_v7, %v854_v47  ;;  %1682 = vmatpush.bf16.msrb.mxu2 %v2342_v14  ;;  %v2324_v37 = vld [vmem:[%s2683_s8 + $0x110] sm:$0xff]  ;;  %vm3115_vm12 = vmor %vm941_vm3, %vm942_vm7 }
  0xf2   : > { %v925_v12 = vadd.f32 %v2906_v30, %v924_v48  ;;  %v968_v5 = vsub.f32 1.0, %v967_v61  ;;  %v3071_v6 = vadd.f32 1.0, %v2439_v36  ;;  %v3075_v17 = vpop.eup %2440  ;;  %v940_v19 = vadd.f32 %v2918_v49, %v939_v57  ;;  %1696 = vmatpush.bf16.msrb.mxu3 %v2350_v15  ;;  %1656 = vmatpush.bf16.msrb.mxu0 %v2324_v37 }
  0xf3   : > { %v954_v20 = vmul.f32 %v2986_v21, %v953_v58  ;;  %2444 = vpow2.f32 %v1986_v56  ;;  %v1991_v7 = vmul.f32 -1.442695, %v2992_v22  ;;  %v3083_v25 = vmul.f32 %v844_v3, %v2813_v24 }
  0xf4   : > { %v3085_v28 = vor.u32 1.1754944e-38, %v962_v60  ;;  %v862_v31 = vmul.f32 %v3075_v17, %v2989_v29  ;;  %v1992_v33 = vmul.f32 -1.442695, %v3032_v52  ;;  %v2443_v39 = vpop.eup %2442  ;;  %v3093_v23 = vmul.f32 %v859_v10, %v2816_v26 }
  0xf5   : > { %vm971_vm11 = vweird.f32 %v2930_v54  ;;  %v975_v42 = vand.u32 2147483647, %v2930_v54  ;;  %2446 = vrcp.f32 %v3071_v6  ;;  %v929_v26 = vsel %vm3099_vm10, %v2906_v30, %v925_v12  ;;  %v2341_v30 = vld [vmem:[%s2683_s8 + $0x198] sm:$0xff] }
  0xf6   : > { %vm957_vm13 = vweird.f32 %v2986_v21  ;;  %vm3120_vm14 = vcmp.eq.f32.partialorder %v960_v50, 8.507059e+37  ;;  %v969_v48 = vmul.f32 %v3036_v53, %v968_v5  ;;  %v863_v18 = vsub.f32 1.0, %v862_v31  ;;  %1683 = vmatpush.bf16.msrb.mxu2 %v2341_v30  ;;  %1697 = vmatpush.bf16.msrb.mxu3 %v2349_v2  ;;  %v3164_v5 = vpop.f32.mrf.mxu2  ;;  %v2322_v31 = vld [vmem:[%s2683_s8 + $0x100] sm:$0xff]  ;;  %v676_v63 = vpop.f32.mrf.mxu3 }
  0xf7   : > { %v944_v0 = vsel %vm3115_vm12, %v2918_v49, %v940_v19  ;;  %v955_v47 = vadd.f32 %v2986_v21, %v954_v20  ;;  %v3131_v57 = vadd.f32 1.0, %v2443_v39  ;;  %2448 = vpow2.f32 %v1991_v7  ;;  %v2331_v49 = vld [vmem:[%s2683_s8 + $0x148] sm:$0xff]  ;;  %vm3156_vm0 = vmor %vm956_vm9, %vm957_vm13  ;;  %1657 = vmatpush.bf16.msrb.mxu0 %v2323_v62 }
  0xf8   : > { %v977_v58 = vand.u32 2147483648, %v2930_v54  ;;  %v864_v60 = vmul.f32 %v3075_v17, %v863_v18  ;;  %2450 = vpow2.f32 %v1992_v33  ;;  %v1993_v61 = vmul.f32 -1.442695, %v3052_v46  ;;  %1671 = vmatpush.bf16.msrb.mxu1 %v2331_v49  ;;  %v2330_v33 = vld [vmem:[%s2683_s8 + $0x140] sm:$0xff]  ;;  %v650_v50 = vpop.f32.mrf.mxu1 }
  0xf9   : > { %v2445_v36 = vpop.eup %2444  ;;  %v934_v3 = vsel %vm3043_vm6, %v3030_v51, %v929_v26  ;;  %vm3143_vm15 = vcmp.eq.f32.partialorder %v975_v42, 8.507059e+37  ;;  %v870_v56 = vand.u32 2147483647, %v2989_v29  ;;  %2452 = vrcp.f32 %v3131_v57  ;;  %v2338_v49 = vld [vmem:[%s2683_s8 + $0x180] sm:$0xff] }
  0xfa   : > { %v949_v10 = vsel %vm3060_vm8, %v3047_v59, %v944_v0  ;;  %v970_v51 = vadd.f32 %v3036_v53, %v969_v48  ;;  %vm972_vm2 = vweird.f32 %v3036_v53  ;;  %v3162_v34 = vadd.f32 1.0, %v2445_v36  ;;  %v2340_v59 = vld [vmem:[%s2683_s8 + $0x190] sm:$0xff]  ;;  %1698 = vmatpush.bf16.msrb.mxu3 %v2348_v4  ;;  %v2347_v48 = vld [vmem:[%s2683_s8 + $0x1c8] sm:$0xff] }
  0xfb   : > { %v3168_v35 = vpop.eup %2446  ;;  %v959_v14 = vsel %vm3156_vm0, %v2986_v21, %v955_v47  ;;  %vm866_vm3 = vweird.f32 %v2989_v29  ;;  %v872_v15 = vand.u32 2147483648, %v2989_v29  ;;  %v1994_v19 = vmul.f32 -1.442695, %v3080_v11  ;;  %1684 = vmatpush.bf16.msrb.mxu2 %v2340_v59  ;;  %v2339_v21 = vld [vmem:[%s2683_s8 + $0x188] sm:$0xff]  ;;  %vm3193_vm5 = vmor %vm971_vm11, %vm972_vm2  ;;  %1658 = vmatpush.bf16.msrb.mxu0 %v2322_v31 }
  0xfc   : > { %v865_v20 = vadd.f32 %v3075_v17, %v864_v60  ;;  %vm867_vm4 = vweird.f32 %v3075_v17  ;;  %v877_v7 = vmul.f32 %v3168_v35, %v3071_v6  ;;  %2454 = vpow2.f32 %v1993_v61  ;;  %1672 = vmatpush.bf16.msrb.mxu1 %v2330_v33 }
  0xfd   : > { %v2449_v37 = vpop.eup %2448  ;;  %v3184_v38 = vmul.f32 %v934_v3, %v2818_v27  ;;  %v3187_v39 = vmul.f32 %v949_v10, %v2823_v32  ;;  %v978_v42 = vor.u32 1.1754944e-38, %v977_v58  ;;  %vm3197_vm6 = vcmp.eq.f32.partialorder %v870_v56, 8.507059e+37  ;;  %vm3217_vm7 = vmor %vm866_vm3, %vm867_vm4  ;;  %v636_v58 = vpop.f32.mrf.mxu0 }
  0xfe   : > { %v2451_v27 = vpop.eup %2450  ;;  %v974_v32 = vsel %vm3193_vm5, %v3036_v53, %v970_v51  ;;  %v878_v18 = vsub.f32 1.0, %v877_v7  ;;  %2456 = vrcp.f32 %v3162_v34  ;;  %v3206_v54 = vadd.f32 1.0, %v2449_v37  ;;  %1699 = vmatpush.bf16.msrb.mxu3 %v2347_v48 }
  0xff   : > { %v3208_v30 = vpop.eup %2452  ;;  %v964_v2 = vsel %vm3120_vm14, %v3085_v28, %v959_v14  ;;  %v887_v0 = vand.u32 2147483648, %v3071_v6  ;;  %v3222_v47 = vadd.f32 1.0, %v2451_v27  ;;  %2458 = vpow2.f32 %v1994_v19  ;;  %1685 = vmatpush.bf16.msrb.mxu2 %v2339_v21 }
 0x100   : > { %v869_v28 = vsel %vm3217_vm7, %v3075_v17, %v865_v20  ;;  %v873_v43 = vor.u32 1.1754944e-38, %v872_v15  ;;  %v885_v60 = vand.u32 2147483647, %v3071_v6  ;;  %v3230_v29 = vmul.f32 %v3002_v41, %v3106_v16  ;;  %v2346_v17 = vld [vmem:[%s2683_s8 + $0x1c0] sm:$0xff] }
 0x101   : > { %v979_v61 = vsel %vm3143_vm15, %v978_v42, %v974_v32  ;;  %vm881_vm8 = vweird.f32 %v3071_v6  ;;  %v902_v62 = vand.u32 2147483648, %v3131_v57  ;;  %2460 = vrcp.f32 %v3206_v54  ;;  %v678_v42 = vpop.f32.mrf.mxu3 }
 0x102   : > { %v2455_v36 = vpop.eup %2454  ;;  %v3240_v3 = vmul.f32 %v964_v2, %v2835_v40  ;;  %v879_v41 = vmul.f32 %v3168_v35, %v878_v18  ;;  %v892_v16 = vmul.f32 %v3208_v30, %v3131_v57  ;;  %2462 = vrcp.f32 %v3222_v47  ;;  %1700 = vmatpush.bf16.msrb.mxu3 %v2346_v17 }
 0x103   : > { %v874_v56 = vsel %vm3197_vm6, %v873_v43, %v869_v28  ;;  %v888_v10 = vor.u32 1.1754944e-38, %v887_v0  ;;  %v900_v12 = vand.u32 2147483647, %v3131_v57  ;;  %v3251_v51 = vmul.f32 %v3016_v45, %v3136_v9  ;;  %v664_v45 = vpop.f32.mrf.mxu2  ;;  %1686 = vmatpush.bf16.msrb.mxu2 %v2338_v49 }
 0x104   : > { %v3253_v40 = vpop.eup %2456  ;;  %v3256_v59 = vmul.f32 %v979_v61, %v2839_v44  ;;  %vm882_vm9 = vweird.f32 %v3168_v35  ;;  %vm3259_vm10 = vcmp.eq.f32.partialorder %v885_v60, 8.507059e+37  ;;  %v3265_v14 = vmul.f32 %v3083_v25, %v3164_v5 }
 0x105   : > { %v3268_v15 = vmul.f32 %v3093_v23, %v676_v63  ;;  %v2459_v9 = vpop.eup %2458  ;;  %v3270_v19 = vor.u32 1.1754944e-38, %v902_v62  ;;  %v990_v44 = vand.u32 2147483647, %v3206_v54  ;;  %v992_v20 = vand.u32 2147483648, %v3206_v54  ;;  %vm3297_vm13 = vmor %vm881_vm8, %vm882_vm9  ;;  %v3320_v62 = vpop.f32.mrf.mxu1 }
 0x106   : > { %v3274_v7 = vadd.f32 1.0, %v2455_v36  ;;  %v3277_v31 = vmul.f32 %v874_v56, %v2865_v1  ;;  %v880_v25 = vadd.f32 %v3168_v35, %v879_v41  ;;  %v893_v5 = vsub.f32 1.0, %v892_v16 }
 0x107   : > { %v915_v23 = vand.u32 2147483647, %v3162_v34  ;;  %v2461_v33 = vpop.eup %2460  ;;  %v907_v21 = vmul.f32 %v3253_v40, %v3162_v34  ;;  %v917_v37 = vand.u32 2147483648, %v3162_v34  ;;  %v3285_v24 = vadd.f32 1.0, %v2459_v9 }
 0x108   : > { %2464 = vrcp.f32 %v3274_v7  ;;  %v3287_v26 = vpop.eup %2462  ;;  %vm897_vm11 = vweird.f32 %v3208_v30  ;;  %v982_v1 = vmul.f32 %v2461_v33, %v3206_v54  ;;  %vm986_vm12 = vweird.f32 %v3206_v54 }
 0x109   : > { %v1065_v63 = vmul.f32 %v3184_v38, %v636_v58  ;;  %vm896_vm14 = vweird.f32 %v3131_v57  ;;  %vm3302_vm15 = vcmp.eq.f32.partialorder %v990_v44, 8.507059e+37  ;;  %v993_v32 = vor.u32 1.1754944e-38, %v992_v20  ;;  %v3309_v38 = vpop.f32.mrf.mxu0 }
 0x10a   : > { %v997_v18 = vmul.f32 %v3287_v26, %v3222_v47  ;;  %vm1001_vm0 = vweird.f32 %v3222_v47  ;;  %v884_v6 = vsel %vm3297_vm13, %v3168_v35, %v880_v25  ;;  %v894_v2 = vmul.f32 %v3208_v30, %v893_v5 }
 0x10b   : > { %v983_v53 = vsub.f32 1.0, %v982_v1  ;;  %v1005_v0 = vand.u32 2147483647, %v3222_v47  ;;  %v908_v58 = vsub.f32 1.0, %v907_v21  ;;  %v1007_v43 = vand.u32 2147483648, %v3222_v47 }
 0x10c   : > { %v998_v28 = vsub.f32 1.0, %v997_v18  ;;  %2466 = vrcp.f32 %v3285_v24  ;;  %vm912_vm2 = vweird.f32 %v3253_v40  ;;  %vm987_vm3 = vweird.f32 %v2461_v33 }
 0x10d   : > { %v984_v60 = vmul.f32 %v2461_v33, %v983_v53  ;;  %v1075_v61 = vpack.c.bf16 %v1065_v63, %v3230_v29  ;;  %v3326_v49 = vsel %vm3259_vm10, %v888_v10, %v884_v6  ;;  %vm911_vm4 = vweird.f32 %v3162_v34  ;;  %v3339_v10 = vpop.f32.mrf.mxu2  ;;  %vm988_vm8 = vmor %vm986_vm12, %vm987_vm3 }
 0x10e   : > { %v3322_v35 = vpop.eup %2464  ;;  %v999_v17 = vmul.f32 %v3287_v26, %v998_v28  ;;  %vm1002_vm5 = vweird.f32 %v3287_v26  ;;  %v1066_v36 = vmul.f32 %v3187_v39, %v650_v50  ;;  %v895_v41 = vadd.f32 %v3208_v30, %v894_v2  ;;  %vm3377_vm12 = vmor %vm896_vm14, %vm897_vm11  ;;  %v706_v28 = vpop.f32.mrf.mxu1 }
 0x10f   : > { %v985_v16 = vadd.f32 %v2461_v33, %v984_v60  ;;  %vm3333_vm6 = vcmp.eq.f32.partialorder %v1005_v0, 8.507059e+37  ;;  %v1012_v56 = vmul.f32 %v3322_v35, %v3274_v7  ;;  %1603 = vmatmul.bf16.vlgmr.msra.gmra.mxu0 %v1075_v61  ;;  %vm3341_vm7 = vcmp.eq.f32.partialorder %v900_v12, 8.507059e+37  ;;  %vm3356_vm9 = vmor %vm1001_vm0, %vm1002_vm5 }
 0x110   : > { %v909_v9 = vmul.f32 %v3253_v40, %v908_v58  ;;  %v1000_v39 = vadd.f32 %v3287_v26, %v999_v17  ;;  %v1076_v50 = vpack.c.bf16 %v1066_v36, %v3251_v51  ;;  %v1067_v44 = vmul.f32 %v3240_v3, %v664_v45  ;;  %vm3404_vm0 = vmor %vm911_vm4, %vm912_vm2 }
 0x111   : > { %v989_v20 = vsel %vm988_vm8, %v2461_v33, %v985_v16  ;;  %v1013_v25 = vsub.f32 1.0, %v1012_v56  ;;  %v1020_v5 = vand.u32 2147483647, %v3274_v7  ;;  %v1068_v54 = vmul.f32 %v3256_v59, %v678_v42  ;;  %v732_v33 = vpop.f32.mrf.mxu3  ;;  %v692_v48 = vpop.f32.mrf.mxu0 }
 0x112   : > { %v2467_v21 = vpop.eup %2466  ;;  %vm3362_vm10 = vcmp.eq.f32.partialorder %v915_v23, 8.507059e+37  ;;  %v994_v3 = vsel %vm3302_vm15, %v993_v32, %v989_v20  ;;  %v1004_v47 = vsel %vm3356_vm9, %v3287_v26, %v1000_v39  ;;  %v1022_v51 = vand.u32 2147483648, %v3274_v7  ;;  %1617 = vmatmul.bf16.vlgmr.msra.gmra.mxu1 %v1076_v50 }
 0x113   : > { %v1077_v45 = vpack.c.bf16 %v1067_v44, %v3265_v14  ;;  %v1008_v23 = vor.u32 1.1754944e-38, %v1007_v43  ;;  %v1014_v42 = vmul.f32 %v3322_v35, %v1013_v25  ;;  %vm1017_vm13 = vweird.f32 %v3322_v35 }
 0x114   : > { %v1027_v26 = vmul.f32 %v2467_v21, %v3285_v24  ;;  %v899_v14 = vsel %vm3377_vm12, %v3208_v30, %v895_v41  ;;  %v910_v63 = vadd.f32 %v3253_v40, %v909_v9  ;;  %vm1016_vm15 = vweird.f32 %v3274_v7 }
 0x115   : > { %v1078_v57 = vpack.c.bf16 %v1068_v54, %v3268_v15  ;;  %1631 = vmatmul.bf16.vlgmr.msra.gmra.mxu2 %v1077_v45  ;;  %v1053_v27 = vmul.f32 %v994_v3, %v2992_v22  ;;  %v1009_v32 = vsel %vm3333_vm6, %v1008_v23, %v1004_v47  ;;  %v1015_v18 = vadd.f32 %v3322_v35, %v1014_v42  ;;  %vm3394_vm11 = vmor %vm1016_vm15, %vm1017_vm13  ;;  %v720_v16 = vpop.f32.mrf.mxu2 }
 0x116   : > { %v1028_v6 = vsub.f32 1.0, %v1027_v26  ;;  %vm1021_vm14 = vcmp.eq.f32.partialorder %v1020_v5, 8.507059e+37  ;;  %v1023_v30 = vor.u32 1.1754944e-38, %v1022_v51  ;;  %v1035_v7 = vand.u32 2147483647, %v3285_v24 }
 0x117   : > { %v1037_v15 = vand.u32 2147483648, %v3285_v24  ;;  %1645 = vmatmul.bf16.vlgmr.msra.gmra.mxu3 %v1078_v57  ;;  %v1019_v53 = vsel %vm3394_vm11, %v3322_v35, %v1015_v18  ;;  %vm1032_vm3 = vweird.f32 %v2467_v21  ;;  %v1069_v58 = vmul.f32 %v1053_v27, %v692_v48  ;;  %v1073_v57 = vld [vmem:[#allocation2] sm:$0xff] }
 0x118   : > { %v1029_v0 = vmul.f32 %v2467_v21, %v1028_v6  ;;  %v914_v43 = vsel %vm3404_vm0, %v3253_v40, %v910_v63  ;;  %v918_v60 = vor.u32 1.1754944e-38, %v917_v37  ;;  %v1054_v61 = vmul.f32 %v1009_v32, %v3032_v52 }
 0x119   : > { %v1024_v17 = vsel %vm1021_vm14, %v1023_v30, %v1019_v53  ;;  %v904_v36 = vsel %vm3341_vm7, %v3270_v19, %v899_v14  ;;  %vm1031_vm2 = vweird.f32 %v3285_v24  ;;  %v1061_v35 = vmul.f32 %v3277_v31, %v3309_v38  ;;  %v734_v9 = vpop.f32.mrf.mxu3 }
 0x11a   : > { %v1030_v41 = vadd.f32 %v2467_v21, %v1029_v0  ;;  %v1046_v40 = vmul.f32 %v3326_v49, %v2876_v8  ;;  %v1055_v34 = vmul.f32 %v1024_v17, %v3052_v46  ;;  %vm1033_vm4 = vmor %vm1031_vm2, %vm1032_vm3  ;;  %v1038_v37 = vor.u32 1.1754944e-38, %v1037_v15  ;;  %v1074_v15 = vld [vmem:[#allocation2 + $0x8] sm:$0xff] }
 0x11b   : > { %v1070_v52 = vmul.f32 %v1054_v61, %v706_v28  ;;  %v919_v29 = vsel %vm3362_vm10, %v918_v60, %v914_v43  ;;  %vm1036_vm5 = vcmp.eq.f32.partialorder %v1035_v7, 8.507059e+37  ;;  %v1079_v19 = vpack.c.bf16 %v1069_v58, %v1061_v35 }
 0x11c   : > { %v1034_v56 = vsel %vm1033_vm4, %v2467_v21, %v1030_v41  ;;  %v1047_v24 = vmul.f32 %v904_v36, %v2932_v55  ;;  %v1062_v31 = vmul.f32 %v1046_v40, %v3320_v62  ;;  %v1071_v38 = vmul.f32 %v1055_v34, %v720_v16 }
 0x11d   : > { %v1039_v4 = vsel %vm1036_vm5, %v1038_v37, %v1034_v56  ;;  %v1048_v46 = vmul.f32 %v919_v29, %v2978_v13 }
 0x11e   : > { %v1056_v8 = vmul.f32 %v1039_v4, %v3080_v11  ;;  %v1063_v49 = vmul.f32 %v1047_v24, %v3339_v10  ;;  %v1080_v39 = vpack.c.bf16 %v1070_v52, %v1062_v31 }
 0x11f   : > { %1659 = vmatmul.bf16.vlgmr.msrb.gmra.mxu0 %v1079_v19  ;;  %v1064_v44 = vmul.f32 %v1048_v46, %v732_v33 }
 0x120   : > { %v1072_v50 = vmul.f32 %v1056_v8, %v734_v9  ;;  %v1081_v20 = vpack.c.bf16 %v1071_v38, %v1063_v49 }
 0x122   : > { %1673 = vmatmul.bf16.vlgmr.msrb.gmra.mxu1 %v1080_v39  ;;  %v1082_v12 = vpack.c.bf16 %v1072_v50, %v1064_v44 }
 0x125   : > { %1687 = vmatmul.bf16.vlgmr.msrb.gmra.mxu2 %v1081_v20 }
 0x127   : > { %1701 = vmatmul.bf16.vlgmr.msrb.gmra.mxu3 %v1082_v12 }
 0x18c   : > { %v1604_v55 = vpop.f32.mrf.mxu0 }
 0x18f   : > { %v1618_v25 = vpop.f32.mrf.mxu1 }
 0x190   : > { %v1619_v54 = vadd.f32 %v1618_v25, %v1604_v55 }
 0x194   : > { %v1606_v62 = vpop.f32.mrf.mxu0 }
 0x197   : > { %v1620_v21 = vpop.f32.mrf.mxu1 }
 0x198   : > { %v1632_v5 = vpop.f32.mrf.mxu2  ;;  %v1621_v47 = vadd.f32 %v1620_v21, %v1606_v62 }
 0x199   : > { %v1633_v1 = vadd.f32 %v1632_v5, %v1619_v54 }
 0x19a   : > { %v1646_v11 = vpop.f32.mrf.mxu3 }
 0x19b   : > { %v1647_v3 = vadd.f32 %v1646_v11, %v1633_v1 }
 0x19c   : > { %v1660_v13 = vpop.f32.mrf.mxu0 }
 0x19d   : > { %v1661_v45 = vadd.f32 %v1660_v13, %v1647_v3 }
 0x19f   : > { %v1674_v59 = vpop.f32.mrf.mxu1 }
 0x1a0   : > { %v1634_v10 = vpop.f32.mrf.mxu2  ;;  %v1675_v23 = vadd.f32 %v1674_v59, %v1661_v45 }
 0x1a1   : > { %v1635_v33 = vadd.f32 %v1634_v10, %v1621_v47 }
 0x1a2   : > { %v1648_v51 = vpop.f32.mrf.mxu3 }
 0x1a3   : > { %v1649_v42 = vadd.f32 %v1648_v51, %v1635_v33 }
 0x1a4   : > { %v1662_v26 = vpop.f32.mrf.mxu0 }
 0x1a5   : > { %v1663_v27 = vadd.f32 %v1662_v26, %v1649_v42 }
 0x1a7   : > { %v1676_v6 = vpop.f32.mrf.mxu1 }
 0x1a8   : > { %v1688_v14 = vpop.f32.mrf.mxu2  ;;  %v1677_v2 = vadd.f32 %v1676_v6, %v1663_v27 }
 0x1a9   : > { %v1689_v63 = vadd.f32 %v1688_v14, %v1675_v23 }
 0x1aa   : > { %v1702_v48 = vpop.f32.mrf.mxu3 }
 0x1ab   : > { %v1703_v32 = vadd.f32 %v1702_v48, %v1689_v63 }
 0x1ad   : > { %v1707_v18 = vadd.f32 %v1703_v32, %v1073_v57 }
 0x1af   : > { %1709 = vst.msk [vmem:[#allocation2] sm:$0xff] %vm509_vm1, %v1707_v18 }
 0x1b0   : > { %v1690_v30 = vpop.f32.mrf.mxu2 }
 0x1b1   : > { %v1691_v7 = vadd.f32 %v1690_v30, %v1677_v2 }
 0x1b2   : > { %v1704_v22 = vpop.f32.mrf.mxu3 }
 0x1b3   : > { %v1705_v53 = vadd.f32 %v1704_v22, %v1691_v7  ;;  %1714 = sbr.rel (%p2251_p11) target bundleno = 450 (0x1c2), region = 63 }
 0x1b5   : > { %v1708_v0 = vadd.f32 %v1705_v53, %v1074_v15 }
 0x1b7   : > { %1710 = vst.msk [vmem:[#allocation2 + $0x8] sm:$0xff] %vm509_vm1, %v1708_v0 }
 0x1b8   : > { %v1715_v58 = vld [vmem:[#allocation2] sm:$0xff]  ;;  %vm1719_vm6 = vcmask 257024  }
 0x1b9   : > { %v1717_v43 = vpack.c.bf16 %v1715_v58, %v1715_v58 }
 0x1bb   : > { %1720 = vst.msk [vmem:[#allocation4] sm:$0xf] %vm1719_vm6, %v1717_v43 }
 0x1be   : > { %v1716_v28 = vld [vmem:[#allocation2 + $0x8] sm:$0xff] }
 0x1bf   : > { %v1718_v60 = vpack.c.bf16 %v1716_v28, %v1716_v28 }
 0x1c1   : > { %1721 = vst.msk [vmem:[#allocation4 + $0x4] sm:$0xf] %vm1719_vm6, %v1718_v60 }
 0x1c2 PF: > { %p2358_p12 = scmp.eq.s32.totalorder %s1819_s17, 2  ;;  %s1732_s20 = sshll.u32 %s3459_s3, 4  ;;  %s1733_s20 = int_to_ptr.hbm [resolvable:$true] %s1732_s20 }
 0x1c3   : > { %s2541_s22 = smov [#allocation4]   ;;  %s2542_s14 = smov 64  }
 0x1c4   : > { %s1730_s23 = sshll.u32 %s2541_s22, 4  ;;  %s2543_s24 = smov 4   ;;  %s1731_s23 = int_to_ptr.vmem [resolvable:$true] %s1730_s23 }
 0x1c5   : > { %2355 = dma.vmem_to_hbm [thread:$0]  (%p2358_p12), %s1731_s23, 128, %s1733_s20, [#allocation5], %s2542_s14, %s2542_s14, %s2543_s24  }
 0x1c6   : > { %2517 = dma.done.wait (%p2358_p12), [#allocation5], 128  }
 0x1c7   : > { %2519 = vsyncadd (%p2358_p12), [#allocation5], 4294967168 }
 0x1c8 PF: > { %s14_s16 = sadd.s32 1, %s2538_s16   ;;  %s3516_s12 = smov %s2526_s13 }
 0x1c9   : > { %p11_p13 = scmp.ge.s32.totalorder %s14_s16, 5   ;;  %s3517_s13 = smov %s2600_s21 }
 0x1ca   : > { %s3518_s14 = smov %s2534_s15  ;;  %s3519_s15 = smov %s3521_s18 }
 0x1cb   :  { %13 = sbr.rel (!%p11_p13) target bundleno = 3 (0x3), region = 102 }
 0x1d0   :  { %1749 = vsyncpa [#allocation5], 1 }
 0x1d1   :  { %1751 = vsyncpa [#allocation5 + $0x1], 1 }

</bundles_post_ra>
